<compile_context>
chip_gen: v7x
topology: tpu7x:2x2x1
jax: 0.10.0
libtpu: 0.0.40
codegen_flags: <defaults>
</compile_context>

<pallas_src>
import functools

import jax
import jax.numpy as jnp
from jax import lax
from jax.experimental import pallas as pl
from jax.experimental.pallas import tpu as pltpu


def _weighted_mse_kernel(w_ref, o_ref, l_ref, out_ref, acc_ref, *,
                         tb, tiles_per_core, b_rows, needs_mask):
    c = pl.program_id(0)          # parallel axis (TensorCore split on v7x)
    i = pl.program_id(1)          # reduction axis (batch tiles for this core)

    @pl.when(i == 0)
    def _():
        acc_ref[...] = jnp.zeros_like(acc_ref)

    w = w_ref[...].astype(jnp.float32)        # (1, N) broadcasts over rows
    o = o_ref[...].astype(jnp.float32)        # (tb, N)
    l = l_ref[...].astype(jnp.float32)        # (tb, N)
    d = (o - l) * w
    d2 = d * d
    if needs_mask:
        # Rows past the true batch (ragged last tile / phantom tiles of the
        # 2-way split) may hold garbage from OOB reads: mask the residual
        # itself so 0*NaN never reaches the accumulator.
        t = c * tiles_per_core + i            # logical (unclamped) tile id
        row = t * tb + lax.broadcasted_iota(jnp.int32, d2.shape, 0)
        d2 = jnp.where(row < b_rows, d2, 0.0)
    # Fold (tb, N) into the small (8, N) accumulator: pure VPU adds over
    # adjacent vregs (no XLU); acc VMEM traffic independent of tile size.
    acc_ref[...] += jnp.sum(d2.reshape(tb // 8, 8, d2.shape[-1]), axis=0)

    @pl.when(i == pl.num_programs(1) - 1)
    def _():
        # one cross-lane reduction per core; mean is taken in the wrapper
        out_ref[0, 0] = jnp.sum(acc_ref[...])


def _device_vmem_bytes():
    try:
        cap = getattr(pltpu.get_tpu_info(), "vmem_capacity_bytes", None)
        if cap:
            return int(cap)
    except Exception:
        pass
    return 64 << 20   # conservative default (v7x has the smallest VMEM)


def _round_up(x, m):
    return ((x + m - 1) // m) * m


def weighted_loss_var(output, labels, var, *, max_block_bytes=None):
    """JAX/Pallas equivalent of the PyTorch module's forward pass.

    output, labels: flat arrays of length B*N (f32 or bf16; upcast in-kernel).
    var:            per-node variance, length N.
    Returns a scalar float32 loss.
    """
    n = int(var.shape[0])
    if output.shape[0] != labels.shape[0]:
        raise ValueError("output and labels must have the same length")
    if n == 0 or output.shape[0] % n != 0:
        raise ValueError(
            f"output length {output.shape[0]} is not a multiple of len(var)={n}")
    b = output.shape[0] // n
    total_elems = b * n

    weights = jnp.sqrt(var.astype(jnp.float32)).reshape(1, n)
    o2 = output.reshape(b, n)        # streamed in native dtype (bf16 ok)
    l2 = labels.reshape(b, n)

    elem_bytes = max(o2.dtype.itemsize, l2.dtype.itemsize)
    # sublane alignment of the streamed tiles; kernel fold needs a multiple of 8
    row_align = 8 if elem_bytes >= 4 else (16 if elem_bytes == 2 else 32)

    vmem_cap = _device_vmem_bytes()
    # One streamed block budget: 2 inputs x 2 pipeline buffers = 4 blocks in
    # flight plus ~2 block-sized elementwise temporaries in the body, plus the
    # tiny acc/weights -> keep a single block at ~1/7 of physical VMEM.
    per_block = max(256 << 10, vmem_cap // 7)
    if max_block_bytes is not None:
        per_block = min(per_block, int(max_block_bytes))

    bytes_per_row = n * elem_bytes
    tb = max(row_align, (per_block // max(1, bytes_per_row)) // row_align * row_align)
    tb = min(tb, _round_up(b, row_align))

    tiles_total = -(-b // tb)
    # Leading "parallel" axis of size 2 -> both TensorCores on v7x; on
    # single-core chips it simply runs sequentially (negligible overhead).
    num_cores = 2 if tiles_total >= 2 else 1
    tiles_per_core = -(-tiles_total // num_cores)
    needs_mask = (num_cores * tiles_per_core * tb) != b

    def stream_map(c, i):
        # clamp phantom tiles of the split onto the last real tile (masked out)
        t = jnp.minimum(c * tiles_per_core + i, tiles_total - 1)
        return (t, 0)

    kernel = functools.partial(
        _weighted_mse_kernel, tb=tb, tiles_per_core=tiles_per_core,
        b_rows=b, needs_mask=needs_mask)

    blk_bytes = tb * bytes_per_row
    vmem_limit = int(max(32 << 20,
                         min(vmem_cap - (2 << 20), 6 * blk_bytes + (8 << 20))))

    partials = pl.pallas_call(
        kernel,
        out_shape=jax.ShapeDtypeStruct((num_cores, 1), jnp.float32),
        grid_spec=pltpu.PrefetchScalarGridSpec(
            num_scalar_prefetch=0,
            grid=(num_cores, tiles_per_core),
            in_specs=[
                pl.BlockSpec((1, n), lambda c, i: (0, 0)),   # weights (resident)
                pl.BlockSpec((tb, n), stream_map),           # output tile
                pl.BlockSpec((tb, n), stream_map),           # labels tile
            ],
            out_specs=pl.BlockSpec((1, 1), lambda c, i: (c, 0),
                                   memory_space=pltpu.SMEM),
            scratch_shapes=[pltpu.VMEM((8, n), jnp.float32)],
        ),
        compiler_params=pltpu.CompilerParams(
            dimension_semantics=("parallel", "arbitrary"),
            vmem_limit_bytes=vmem_limit,
        ),
    )(weights, o2, l2)

    # exact reciprocal of the true element count (python int -> double -> f32)
    return jnp.sum(partials) * jnp.float32(1.0 / total_elems)


def _reference(output, labels, var):
    w = jnp.sqrt(var).astype(jnp.float32)
    n = w.shape[0]
    b = output.shape[0] // n
    o = output.reshape(b, n).astype(jnp.float32) * w
    l = labels.reshape(b, n).astype(jnp.float32) * w
    return jnp.mean((o.reshape(-1) - l.reshape(-1)) ** 2)


if __name__ == "__main__":
    key = jax.random.PRNGKey(0)
    k1, k2, k3 = jax.random.split(key, 3)

    # Case 1: small, 128-aligned node count -> single tile, grid (1, 1).
    B, N = 16, 128
    output = jax.random.normal(k1, (B * N,), dtype=jnp.float32)
    labels = jax.random.normal(k2, (B * N,), dtype=jnp.float32)
    var = jax.random.uniform(k3, (N,), dtype=jnp.float32, minval=0.1, maxval=2.0)
    loss = jax.block_until_ready(weighted_loss_var(output, labels, var))
    ref = _reference(output, labels, var)
    assert jnp.allclose(loss, ref, rtol=1e-5, atol=1e-5), (loss, ref)

    # Case 2: ragged batch + non-128 node count, tiny block budget forces the
    # multi-tile path with the 2-way parallel split (grid (2, 2)) + row mask.
    B2, N2 = 50, 96
    k4, k5, k6 = jax.random.split(k3, 3)
    output2 = jax.random.normal(k4, (B2 * N2,), dtype=jnp.float32)
    labels2 = jax.random.normal(k5, (B2 * N2,), dtype=jnp.float32)
    var2 = jax.random.uniform(k6, (N2,), dtype=jnp.float32, minval=0.1, maxval=2.0)
    loss2 = jax.block_until_ready(
        weighted_loss_var(output2, labels2, var2, max_block_bytes=16 * 96 * 4))
    ref2 = _reference(output2, labels2, var2)
    assert jnp.allclose(loss2, ref2, rtol=1e-5, atol=1e-5), (loss2, ref2)

    # Case 3: odd tile count -> exercises the phantom-tile clamp + full mask.
    B3, N3 = 40, 96
    k7, k8, k9 = jax.random.split(k6, 3)
    output3 = jax.random.normal(k7, (B3 * N3,), dtype=jnp.float32)
    labels3 = jax.random.normal(k8, (B3 * N3,), dtype=jnp.float32)
    var3 = jax.random.uniform(k9, (N3,), dtype=jnp.float32, minval=0.1, maxval=2.0)
    loss3 = jax.block_until_ready(
        weighted_loss_var(output3, labels3, var3, max_block_bytes=16 * 96 * 4))
    ref3 = _reference(output3, labels3, var3)
    assert jnp.allclose(loss3, ref3, rtol=1e-5, atol=1e-5), (loss3, ref3)

    print("KERNEL_OK")
</pallas_src>

<mosaic_0001>
module attributes {stable_mosaic.version = 11 : i64} {
  func.func @_weighted_mse_kernel(%arg0: i32, %arg1: i32, %arg2: memref<1x128xf32, #tpu.memory_space<vmem>>, %arg3: memref<16x128xf32, #tpu.memory_space<vmem>>, %arg4: memref<16x128xf32, #tpu.memory_space<vmem>>, %arg5: memref<1x1xf32, #tpu.memory_space<smem>>, %arg6: memref<8x128xf32, #tpu.memory_space<vmem>>) attributes {dimension_semantics = [#tpu.dimension_semantics<parallel>, #tpu.dimension_semantics<arbitrary>], iteration_bounds = array<i64: 1, 1>, scalar_prefetch = 0 : i64, scratch_operands = 1 : i64, tpu.core_type = #tpu.core_type<tc>, window_params = [{pipeline_mode = #tpu.pipeline_mode<synchronous>, transform_indices = @transform_0, window_bounds = array<i64: 1, 128>}, {transform_indices = @transform_1, window_bounds = array<i64: 16, 128>}, {transform_indices = @transform_2, window_bounds = array<i64: 16, 128>}, {transform_indices = @transform_3, window_bounds = array<i64: 1, 1>}]} {
    %c0_i32 = arith.constant 0 : i32
    %0 = arith.cmpi eq, %arg1, %c0_i32 : i32
    %1 = arith.extui %0 : i1 to i32
    %c0_i32_0 = arith.constant 0 : i32
    %2 = arith.cmpi ne, %1, %c0_i32_0 : i32
    scf.if %2 {
      %cst_12 = arith.constant 0.000000e+00 : f32
      %18 = vector.broadcast %cst_12 : f32 to vector<8x128xf32>
      %c0_13 = arith.constant 0 : index
      %c0_14 = arith.constant 0 : index
      %19 = vector.load %arg6[%c0_13, %c0_14] : memref<8x128xf32, #tpu.memory_space<vmem>>, vector<8x128xf32>
      tpu.vector_store %arg6[%c0_13, %c0_14], %18 {strides = array<i32>} : memref<8x128xf32, #tpu.memory_space<vmem>>, vector<8x128xf32>,
    } else {
    }
    %c0 = arith.constant 0 : index
    %c0_1 = arith.constant 0 : index
    %3 = vector.load %arg2[%c0, %c0_1] : memref<1x128xf32, #tpu.memory_space<vmem>>, vector<1x128xf32>
    %c0_2 = arith.constant 0 : index
    %c0_3 = arith.constant 0 : index
    %4 = vector.load %arg3[%c0_2, %c0_3] : memref<16x128xf32, #tpu.memory_space<vmem>>, vector<16x128xf32>
    %c0_4 = arith.constant 0 : index
    %c0_5 = arith.constant 0 : index
    %5 = vector.load %arg4[%c0_4, %c0_5] : memref<16x128xf32, #tpu.memory_space<vmem>>, vector<16x128xf32>
    %6 = arith.subf %4, %5 : vector<16x128xf32>
    %7 = vector.broadcast %3 : vector<1x128xf32> to vector<16x128xf32>
    %8 = arith.mulf %6, %7 : vector<16x128xf32>
    %9 = arith.mulf %8, %8 : vector<16x128xf32>
    %c0_6 = arith.constant 0 : index
    %c0_7 = arith.constant 0 : index
    %10 = vector.load %arg6[%c0_6, %c0_7] : memref<8x128xf32, #tpu.memory_space<vmem>>, vector<8x128xf32>
    %11 = vector.shape_cast %9 : vector<16x128xf32> to vector<2x8x128xf32>
    %cst = arith.constant dense<0.000000e+00> : vector<8x128xf32>
    %12 = vector.multi_reduction <add>, %11, %cst [0] : vector<2x8x128xf32> to vector<8x128xf32>
    %13 = arith.addf %10, %12 : vector<8x128xf32>
    %c0_8 = arith.constant 0 : index
    %c0_9 = arith.constant 0 : index
    %14 = vector.load %arg6[%c0_8, %c0_9] : memref<8x128xf32, #tpu.memory_space<vmem>>, vector<8x128xf32>
    tpu.vector_store %arg6[%c0_8, %c0_9], %13 {strides = array<i32>} : memref<8x128xf32, #tpu.memory_space<vmem>>, vector<8x128xf32>,
    %c0_i32_10 = arith.constant 0 : i32
    %15 = arith.cmpi eq, %arg1, %c0_i32_10 : i32
    %16 = arith.extui %15 : i1 to i32
    %c0_i32_11 = arith.constant 0 : i32
    %17 = arith.cmpi ne, %16, %c0_i32_11 : i32
    scf.if %17 {
      %c0_12 = arith.constant 0 : index
      %c0_13 = arith.constant 0 : index
      %18 = vector.load %arg6[%c0_12, %c0_13] : memref<8x128xf32, #tpu.memory_space<vmem>>, vector<8x128xf32>
      %19 = vector.shape_cast %18 : vector<8x128xf32> to vector<1x8x128xf32>
      %cst_14 = arith.constant dense<0.000000e+00> : vector<1xf32>
      %20 = vector.multi_reduction <add>, %19, %cst_14 [1, 2] : vector<1x8x128xf32> to vector<1xf32>
      %21 = vector.shape_cast %20 : vector<1xf32> to vector<1x1x1xf32>
      %22 = vector.extract %21[0, 0, 0] : f32 from vector<1x1x1xf32>
      %c0_15 = arith.constant 0 : index
      %c0_16 = arith.constant 0 : index
      %23 = memref.load %arg5[%c0_15, %c0_16] : memref<1x1xf32, #tpu.memory_space<smem>>
      memref.store %22, %arg5[%c0_15, %c0_16] : memref<1x1xf32, #tpu.memory_space<smem>>
    } else {
    }
    return
  }
  func.func @transform_0(%arg0: i32, %arg1: i32) -> (i32, i32) {
    %c0_i32 = arith.constant 0 : i32
    %c0_i32_0 = arith.constant 0 : i32
    %c0_i32_1 = arith.constant 0 : i32
    return %c0_i32, %c0_i32_0 : i32, i32
  }
  func.func @transform_1(%arg0: i32, %arg1: i32) -> (i32, i32) {
    %c1_i32 = arith.constant 1 : i32
    %0 = arith.muli %arg0, %c1_i32 : i32
    %1 = arith.addi %0, %arg1 : i32
    %c0_i32 = arith.constant 0 : i32
    %2 = arith.minsi %1, %c0_i32 : i32
    %c0_i32_0 = arith.constant 0 : i32
    %c0_i32_1 = arith.constant 0 : i32
    return %2, %c0_i32_0 : i32, i32
  }
  func.func @transform_2(%arg0: i32, %arg1: i32) -> (i32, i32) {
    %c1_i32 = arith.constant 1 : i32
    %0 = arith.muli %arg0, %c1_i32 : i32
    %1 = arith.addi %0, %arg1 : i32
    %c0_i32 = arith.constant 0 : i32
    %2 = arith.minsi %1, %c0_i32 : i32
    %c0_i32_0 = arith.constant 0 : i32
    %c0_i32_1 = arith.constant 0 : i32
    return %2, %c0_i32_0 : i32, i32
  }
  func.func @transform_3(%arg0: i32, %arg1: i32) -> (i32, i32) {
    %c0_i32 = arith.constant 0 : i32
    %c0_i32_0 = arith.constant 0 : i32
    return %arg0, %c0_i32 : i32, i32
  }
}

</mosaic_0001>

<bundles_post_ra>
// kernel: tpu_custom_call.1
= control target key start
LH: loop header
LB: loop body
LE: loop exit
PB: predicated region body
PF: predicated region fallthrough
CT: control target
= control target key end

     0   :  { %8 = vsyncpa [#allocation4], 0  ;;  %s305_s0 = inlined_call_operand.hbm [shape: f32[1,128], index: 0, kind: input, shape index: {}]   ;;  %s306_s1 = inlined_call_operand.hbm [shape: f32[16,128], index: 1, kind: input, shape index: {}]   ;;  %s307_s2 = inlined_call_operand.hbm [shape: f32[16,128], index: 2, kind: input, shape index: {}]   ;;  %s308_s3 = inlined_call_operand.hbm [shape: f32[1,1], index: 3, kind: output, shape index: {}]  }
   0x1   :  { %9 = vsyncpa [#allocation7], 0 }
   0x2   :  { %10 = vsyncpa [#allocation5], 0  ;;  %s225_s12 = smov [#allocation6]   ;;  %s143_s16 = scalar_lea.hbm %s306_s1, 256 }
   0x3   :  { %s32_s13 = sshll.u32 %s225_s12, 4  ;;  %p144_p0 = scmp.ne.s32.totalorder %s306_s1, %s143_s16  ;;  %s33_s13 = int_to_ptr.vmem [resolvable:$true] %s32_s13 }
   0x4   :  { %p147_p1 = scmp.lt.u32.totalorder %s143_s16, %s306_s1 }
   0x6   :  { %p149_p2 = pnand %p147_p1, %p144_p0 }
   0x8   :  { %152 = shalt.err (!%p149_p2)
}
   0x9   :  { %s153_s21 = scalar_lea.vmem %s33_s13, 256  ;;  %p158_p4 = scmp.lt.s32.totalorder %s33_s13, %s33_s13 }
   0xa   :  { %p154_p3 = scmp.ne.s32.totalorder %s33_s13, %s153_s21  ;;  %p159_p5 = scmp.lt.s32.totalorder %s153_s21, %s153_s21 }
   0xc   :  { %p160_p6 = por %p159_p5, %p158_p4 }
   0xe   :  { %p161_p7 = pnand %p160_p6, %p154_p3 }
  0x10   :  { %164 = shalt.err (!%p161_p7)
}
  0x11   :  { %s226_s22 = smov 128   ;;  %s227_s23 = smov 8  }
  0x12   :  { %38 = dma.hbm_to_vmem [thread:$0]  %s306_s1, 256, %s33_s13, [#allocation7], %s226_s22, %s226_s22, %s227_s23  }
  0x13   :  { %s228_s26 = smov [#allocation3]   ;;  %s229_s28 = smov [#allocation8]  }
  0x14   :  { %s17_s27 = sshll.u32 %s228_s26, 4  ;;  %s50_s29 = sshll.u32 %s229_s28, 4  ;;  %s18_s27 = int_to_ptr.vmem [resolvable:$true] %s17_s27  ;;  %s51_s29 = int_to_ptr.vmem [resolvable:$true] %s50_s29 }
  0x15   :  { %s165_s5 = scalar_lea.hbm %s305_s0, 16 }
  0x16   :  { %p166_p8 = scmp.ne.s32.totalorder %s305_s0, %s165_s5  ;;  %p169_p9 = scmp.lt.u32.totalorder %s165_s5, %s305_s0 }
  0x18   :  { %p171_p10 = pnand %p169_p9, %p166_p8 }
  0x1a   :  { %174 = shalt.err (!%p171_p10)
}
  0x1b   :  { %s175_s1 = scalar_lea.vmem %s18_s27, 16  ;;  %s179_s10 = scalar_lea.vmem %s18_s27, 32 }
  0x1c   :  { %p176_p11 = scmp.ne.s32.totalorder %s18_s27, %s175_s1  ;;  %p180_p12 = scmp.lt.s32.totalorder %s18_s27, %s18_s27 }
  0x1d   :  { %p181_p13 = scmp.lt.s32.totalorder %s179_s10, %s175_s1 }
  0x1f   :  { %p182_p0 = por %p181_p13, %p180_p12 }
  0x21   :  { %p183_p1 = pnand %p182_p0, %p176_p11 }
  0x23   :  { %186 = shalt.err (!%p183_p1)
}
  0x24   :  { %20 = dma.hbm_to_vmem [thread:$0]  %s305_s0, 16, %s18_s27, [#allocation4]  }
  0x25   :  { %s187_s15 = scalar_lea.hbm %s307_s2, 256 }
  0x26   :  { %p188_p2 = scmp.ne.s32.totalorder %s307_s2, %s187_s15  ;;  %p191_p3 = scmp.lt.u32.totalorder %s187_s15, %s307_s2 }
  0x28   :  { %p193_p4 = pnand %p191_p3, %p188_p2 }
  0x2a   :  { %196 = shalt.err (!%p193_p4)
}
  0x2b   :  { %s197_s20 = scalar_lea.vmem %s51_s29, 256  ;;  %p202_p6 = scmp.lt.s32.totalorder %s51_s29, %s51_s29 }
  0x2c   :  { %p198_p5 = scmp.ne.s32.totalorder %s51_s29, %s197_s20  ;;  %p203_p7 = scmp.lt.s32.totalorder %s197_s20, %s197_s20 }
  0x2e   :  { %p204_p8 = por %p203_p7, %p202_p6 }
  0x30   :  { %p205_p9 = pnand %p204_p8, %p198_p5 }
  0x32   :  { %208 = shalt.err (!%p205_p9)
}
  0x33   :  { %56 = dma.hbm_to_vmem [thread:$0]  %s307_s2, 256, %s51_s29, [#allocation7], %s226_s22, %s226_s22, %s227_s23  }
  0x34   :  { %219 = dma.done.wait [#allocation4], 16  }
  0x35   :  { %220 = vsyncadd [#allocation4], 4294967280 }
  0x36   :  { %221 = dma.done.wait [#allocation7], 512  }
  0x37   :  { %222 = vsyncadd [#allocation7], 4294966784  ;;  %v80_v0 = vld [vmem:[#allocation6] sm:$0xff]  ;;  %v81_v1 = vld [vmem:[#allocation6 + $0x8] sm:$0xff]  ;;  %s209_s24 = scalar_lea.hbm %s308_s3, 16 }
  0x38   :  { %v134_v2 = vld [vmem:[#allocation3] ss:$0 sm:$0xff]  ;;  %v82_v3 = vld [vmem:[#allocation8] sm:$0xff]  ;;  %p210_p10 = scmp.ne.s32.totalorder %s308_s3, %s209_s24  ;;  %p213_p11 = scmp.lt.u32.totalorder %s209_s24, %s308_s3 }
  0x39   :  { %v83_v4 = vld [vmem:[#allocation8 + $0x8] sm:$0xff]  ;;  %v84_v5 = vsub.f32 %v80_v0, %v82_v3 }
  0x3a   :  { %v85_v6 = vsub.f32 %v81_v1, %v83_v4  ;;  %p215_p12 = pnand %p213_p11, %p210_p10 }
  0x3b   :  { %v92_v7 = vmul.f32 %v134_v2, %v84_v5 }
  0x3c   :  { %v93_v8 = vmul.f32 %v134_v2, %v85_v6 }
  0x3d   :  { %v94_v9 = vmul.f32 %v92_v7, %v92_v7 }
  0x3e   :  { %v95_v10 = vmul.f32 %v93_v8, %v93_v8 }
  0x40   :  { %v97_v11 = vadd.f32 %v95_v10, %v94_v9 }
  0x42   :  { %104 = vadd.xlane.f32.xlu0 %v97_v11 }
  0xcf   :  { %v105_v12 = vpop.xlane.xlu0 %104 }
  0xd0   :  { %v106_v13 = vrot.slane %v105_v12, 4 }
  0xd2   :  { %v107_v14 = vadd.f32 %v106_v13, %v105_v12 }
  0xd4   :  { %v108_v15 = vrot.slane %v107_v14, 2 }
  0xd6   :  { %v109_v16 = vadd.f32 %v108_v15, %v107_v14 }
  0xd8   :  { %v110_v17 = vrot.slane %v109_v16, 1 }
  0xda   :  { %v111_v18 = vadd.f32 %v110_v17, %v109_v16 }
  0xdc   :  { %135 = vpush %v111_v18 }
 0x10d   :  { %s136_s2 = spop %135 }
 0x10e   :  { %114 = sst [smem:[#allocation9]] %s136_s2 }
 0x10f   :  { %218 = shalt.err (!%p215_p12)
}
 0x110   :  { %s230_s29 = smov [#allocation9]  }
 0x111   :  { %122 = dma.smem_to_hbm %s230_s29, 16, %s308_s3, [#allocation5]  }
 0x112   :  { %223 = dma.done.wait [#allocation5], 16  }
 0x113   :  { %224 = vsyncadd [#allocation5], 4294967280 }
 0x114   :  { %126 = sfence }
 0x115   :  { %127 = vsyncpa [#allocation4], 1 }
 0x116   :  { %128 = vsyncpa [#allocation7], 1 }
 0x117   :  { %129 = vsyncpa [#allocation5], 1 }

</bundles_post_ra>
